<compile_context>
chip_gen: v5e
topology: v5e:2x2
jax: 0.10.0
libtpu: 0.0.40
codegen_flags: <defaults>
</compile_context>

<pallas_src>
import jax
import jax.numpy as jnp
import numpy as np
from jax.experimental import pallas as pl
from jax.experimental.pallas import tpu as pltpu


def _round_up(x, m):
    return ((x + m - 1) // m) * m


def _prompt_embed_kernel(packed_ref, gauss_ref, bias_ref, delta_ref, out_ref):
    # packed_ref: (TM, 3)   f32  columns = [x_raw, y_raw, label_as_f32]
    #                            (padding rows carry x=y=-1 and label=-1; they are
    #                             never written back because the output block is
    #                             masked at the ragged boundary)
    # gauss_ref:  (2, C//2) f32  pre-scaled Gaussian matrix (coordinate affine folded in)
    # bias_ref:   (1, C//2) f32  folded affine bias
    # delta_ref:  (3, C)    f32  d0=e0-e1-e2, d1=e1-e0-e2, d2=e2-e0-e1
    # out_ref:    (TM, C)   f32
    c_half = gauss_ref.shape[1]

    x = packed_ref[:, 0:1]                                    # (TM, 1)
    y = packed_ref[:, 1:2]                                    # (TM, 1)
    lab = packed_ref[:, 2:3]                                  # (TM, 1) float labels

    # --- projection: K=2 contraction as VPU broadcast-FMA (MXU left idle on purpose)
    proj = (x * gauss_ref[0:1, :]
            + y * gauss_ref[1:2, :]
            + bias_ref[...])                                  # (TM, C//2)

    # --- label-conditional offset, one half at a time (keeps live ranges small).
    # Labels are mutually exclusive -> nested selects, no adds.
    # label == -1 (padding) rows keep the bare positional encoding, matching the
    # PyTorch module (it only edits rows with labels 0/1/2).
    def label_offset(lo, hi):
        d0 = delta_ref[0:1, lo:hi]
        d1 = delta_ref[1:2, lo:hi]
        d2 = delta_ref[2:3, lo:hi]
        return jnp.where(lab == 0.0, d0,
               jnp.where(lab == 1.0, d1,
               jnp.where(lab == 2.0, d2, jnp.zeros_like(d0))))

    # --- write sin / cos halves directly; each half's offset is computed just
    #     before its store so at most one (TM, C//2) offset is live at a time.
    out_ref[:, :c_half] = jnp.sin(proj) + label_offset(0, c_half)
    out_ref[:, c_half:] = jnp.cos(proj) + label_offset(c_half, 2 * c_half)


def prompt_embedder_forward(points, labels, pad, gauss_matrix, point_embed_weights,
                            image_size, *, row_tile=512):
    """JAX/Pallas equivalent of PromptEmbedder.forward.

    points: (B, N, 2) float32, labels: (B, N) int, pad: python bool.
    Returns (B, N + pad, embed_dim) float32.
    """
    B, N, _ = points.shape
    C = point_embed_weights.shape[1]
    assert C % 2 == 0, "embed_dim must be even"
    H, W = image_size

    pts = points.astype(jnp.float32)
    lbl = labels.astype(jnp.float32)
    if pad:
        # Module pads AFTER the +0.5 shift with zeros; since the +0.5 is folded into
        # the projection constants, the equivalent raw padding coordinate is -0.5.
        pts = jnp.concatenate([pts, jnp.full((B, 1, 2), -0.5, jnp.float32)], axis=1)
        lbl = jnp.concatenate([lbl, jnp.full((B, 1), -1.0, jnp.float32)], axis=1)
    Np = pts.shape[1]
    M = B * Np

    # Single packed per-row input stream: [x, y, label] -> one DMA instead of two.
    packed = jnp.concatenate([pts.reshape(M, 2), lbl.reshape(M, 1)], axis=1)  # (M, 3)

    # Constant-fold the coordinate affine into the (2, C//2) matrix + bias:
    #   proj = 2*pi * ( 2*(p+0.5)/[W,H] - 1 ) @ G = p @ G' + b
    #   G' = 2*pi * diag(2/W, 2/H) @ G
    #   b  = 2*pi * ((1/W - 1) G[0] + (1/H - 1) G[1])
    g = gauss_matrix.astype(jnp.float32)                         # (2, C//2)
    two_pi = jnp.float32(2.0 * np.pi)
    scale = jnp.array([[2.0 / W], [2.0 / H]], jnp.float32)       # (2, 1)
    gauss_scaled = two_pi * scale * g                            # (2, C//2)
    bias = (two_pi * ((1.0 / W - 1.0) * g[0]
                      + (1.0 / H - 1.0) * g[1]))[None, :]        # (1, C//2)

    # Precompute the three label delta rows once (a (3, C) constant).
    e0 = point_embed_weights[0].astype(jnp.float32)
    e1 = point_embed_weights[1].astype(jnp.float32)
    e2 = point_embed_weights[2].astype(jnp.float32)
    deltas = jnp.stack([e0 - e1 - e2, e1 - e0 - e2, e2 - e0 - e1], axis=0)   # (3, C)

    # Row tile: guarantee >=2 grid steps for moderate M (dual-TC sharding /
    # pipelining) while staying small enough for v5e's scoped-VMEM default.
    if M <= 8:
        tm = _round_up(max(M, 1), 8)
    else:
        tm = min(row_tile, _round_up((M + 1) // 2, 8))
    num_blocks = -(-M // tm)
    m_pad = num_blocks * tm

    # Only the tiny input stream is padded (well-defined values for the ragged
    # block); the (M, C) output is written exactly once — no pad + slice copy.
    if m_pad != M:
        packed = jnp.pad(packed, ((0, m_pad - M), (0, 0)), constant_values=-1.0)

    out = pl.pallas_call(
        _prompt_embed_kernel,
        out_shape=jax.ShapeDtypeStruct((M, C), jnp.float32),
        grid=(num_blocks,),
        in_specs=[
            pl.BlockSpec((tm, 3), lambda i: (i, 0)),
            pl.BlockSpec((2, C // 2), lambda i: (0, 0)),
            pl.BlockSpec((1, C // 2), lambda i: (0, 0)),
            pl.BlockSpec((3, C), lambda i: (0, 0)),
        ],
        out_specs=pl.BlockSpec((tm, C), lambda i: (i, 0)),
        compiler_params=pltpu.CompilerParams(
            dimension_semantics=("parallel",)),
        cost_estimate=pl.CostEstimate(
            flops=4 * m_pad * (C // 2) + 7 * m_pad * C,
            transcendentals=m_pad * C,
            bytes_accessed=M * C * 4 + m_pad * 12 + (3 * C + 3 * (C // 2)) * 4),
    )(packed, gauss_scaled, bias, deltas)

    return out.reshape(B, Np, C)


def _reference_forward(points, labels, pad, gauss_matrix, point_embed_weights,
                       image_size):
    """Pure-JAX reference mirroring the PyTorch module's math exactly."""
    B, N, _ = points.shape
    H, W = image_size
    pts = points.astype(jnp.float32) + 0.5
    lbl = labels.astype(jnp.int32)
    if pad:
        pts = jnp.concatenate([pts, jnp.zeros((B, 1, 2), jnp.float32)], axis=1)
        lbl = jnp.concatenate([lbl, -jnp.ones((B, 1), jnp.int32)], axis=1)
    coords = pts.at[..., 0].divide(W).at[..., 1].divide(H)
    coords = 2.0 * coords - 1.0
    proj = 2.0 * np.pi * (coords @ gauss_matrix)
    pe = jnp.concatenate([jnp.sin(proj), jnp.cos(proj)], axis=-1)
    e0, e1, e2 = (point_embed_weights[i][None, None, :] for i in range(3))
    lblx = lbl[..., None]
    pe = pe + jnp.where(lblx == 0, e0 - e1 - e2, 0.0)
    pe = pe + jnp.where(lblx == 1, e1 - e0 - e2, 0.0)
    pe = pe + jnp.where(lblx == 2, e2 - e0 - e1, 0.0)
    return pe


if __name__ == "__main__":
    # Small, deterministic config consistent with the module (SAM embed_dim=256
    # keeps the two half-stores exactly lane-dense: C//2 == 128).
    B, N = 2, 8
    EMBED_DIM = 256
    IMAGE_SIZE = (64, 64)   # (H, W)

    key = jax.random.PRNGKey(0)
    k_pts, k_lbl, k_gauss, k_emb = jax.random.split(key, 4)

    # Inputs: point coords inside the image, labels in {-1, 0, 1, 2}.
    points = jax.random.uniform(k_pts, (B, N, 2), jnp.float32,
                                minval=0.0, maxval=float(IMAGE_SIZE[1]))
    labels = jax.random.randint(k_lbl, (B, N), -1, 3).astype(jnp.int32)

    # Parameters (deterministic synthetic init):
    #   pe_layer.positional_encoding_gaussian_matrix : (2, embed_dim // 2) ~ N(0,1)
    #   point_embeddings[i].weight, i=0..2           : (embed_dim,)        ~ N(0,1)
    gauss_matrix = jax.random.normal(k_gauss, (2, EMBED_DIM // 2), jnp.float32)
    point_embed_weights = jax.random.normal(k_emb, (3, EMBED_DIM), jnp.float32)
    # TODO(synk): not_a_point_embed is initialized in the PyTorch module but never
    # used in this forward path, so it is omitted here.

    out = prompt_embedder_forward(points, labels, pad=True,
                                  gauss_matrix=gauss_matrix,
                                  point_embed_weights=point_embed_weights,
                                  image_size=IMAGE_SIZE)
    out = jax.block_until_ready(out)

    ref = _reference_forward(points, labels, True, gauss_matrix,
                             point_embed_weights, IMAGE_SIZE)
    np.testing.assert_allclose(np.asarray(out), np.asarray(ref),
                               rtol=1e-4, atol=1e-4)

    assert out.shape == (B, N + 1, EMBED_DIM)
    print("KERNEL_OK")
</pallas_src>

<mosaic_0001>
module attributes {stable_mosaic.version = 11 : i64} {
  func.func @_prompt_embed_kernel(%arg0: i32, %arg1: memref<16x3xf32, #tpu.memory_space<vmem>>, %arg2: memref<2x128xf32, #tpu.memory_space<vmem>>, %arg3: memref<1x128xf32, #tpu.memory_space<vmem>>, %arg4: memref<3x256xf32, #tpu.memory_space<vmem>>, %arg5: memref<16x256xf32, #tpu.memory_space<vmem>>) attributes {dimension_semantics = [#tpu.dimension_semantics<parallel>], iteration_bounds = array<i64: 2>, scalar_prefetch = 0 : i64, scratch_operands = 0 : i64, tpu.core_type = #tpu.core_type<tc>, window_params = [{transform_indices = @transform_0, window_bounds = array<i64: 16, 3>}, {pipeline_mode = #tpu.pipeline_mode<synchronous>, transform_indices = @transform_1, window_bounds = array<i64: 2, 128>}, {pipeline_mode = #tpu.pipeline_mode<synchronous>, transform_indices = @transform_2, window_bounds = array<i64: 1, 128>}, {pipeline_mode = #tpu.pipeline_mode<synchronous>, transform_indices = @transform_3, window_bounds = array<i64: 3, 256>}, {transform_indices = @transform_4, window_bounds = array<i64: 16, 256>}]} {
    %c0 = arith.constant 0 : index
    %c0_0 = arith.constant 0 : index
    %0 = vector.load %arg1[%c0, %c0_0] : memref<16x3xf32, #tpu.memory_space<vmem>>, vector<16x1xf32>
    %c0_1 = arith.constant 0 : index
    %c1 = arith.constant 1 : index
    %1 = vector.load %arg1[%c0_1, %c1] : memref<16x3xf32, #tpu.memory_space<vmem>>, vector<16x1xf32>
    %c0_2 = arith.constant 0 : index
    %c2 = arith.constant 2 : index
    %2 = vector.load %arg1[%c0_2, %c2] : memref<16x3xf32, #tpu.memory_space<vmem>>, vector<16x1xf32>
    %c0_3 = arith.constant 0 : index
    %c0_4 = arith.constant 0 : index
    %3 = vector.load %arg2[%c0_3, %c0_4] : memref<2x128xf32, #tpu.memory_space<vmem>>, vector<1x128xf32>
    %4 = vector.broadcast %0 : vector<16x1xf32> to vector<16x128xf32>
    %5 = vector.broadcast %3 : vector<1x128xf32> to vector<16x128xf32>
    %6 = arith.mulf %4, %5 : vector<16x128xf32>
    %c1_5 = arith.constant 1 : index
    %c0_6 = arith.constant 0 : index
    %7 = vector.load %arg2[%c1_5, %c0_6] : memref<2x128xf32, #tpu.memory_space<vmem>>, vector<1x128xf32>
    %8 = vector.broadcast %1 : vector<16x1xf32> to vector<16x128xf32>
    %9 = vector.broadcast %7 : vector<1x128xf32> to vector<16x128xf32>
    %10 = arith.mulf %8, %9 : vector<16x128xf32>
    %11 = arith.addf %6, %10 : vector<16x128xf32>
    %c0_7 = arith.constant 0 : index
    %c0_8 = arith.constant 0 : index
    %12 = vector.load %arg3[%c0_7, %c0_8] : memref<1x128xf32, #tpu.memory_space<vmem>>, vector<1x128xf32>
    %13 = vector.broadcast %12 : vector<1x128xf32> to vector<16x128xf32>
    %14 = arith.addf %11, %13 : vector<16x128xf32>
    %15 = math.sin %14 : vector<16x128xf32>
    %c0_9 = arith.constant 0 : index
    %c0_10 = arith.constant 0 : index
    %16 = vector.load %arg4[%c0_9, %c0_10] : memref<3x256xf32, #tpu.memory_space<vmem>>, vector<1x128xf32>
    %c1_11 = arith.constant 1 : index
    %c0_12 = arith.constant 0 : index
    %17 = vector.load %arg4[%c1_11, %c0_12] : memref<3x256xf32, #tpu.memory_space<vmem>>, vector<1x128xf32>
    %c2_13 = arith.constant 2 : index
    %c0_14 = arith.constant 0 : index
    %18 = vector.load %arg4[%c2_13, %c0_14] : memref<3x256xf32, #tpu.memory_space<vmem>>, vector<1x128xf32>
    %cst = arith.constant 0.000000e+00 : f32
    %19 = vector.broadcast %cst : f32 to vector<16x1xf32>
    %20 = arith.cmpf oeq, %2, %19 : vector<16x1xf32>
    %cst_15 = arith.constant 1.000000e+00 : f32
    %21 = vector.broadcast %cst_15 : f32 to vector<16x1xf32>
    %22 = arith.cmpf oeq, %2, %21 : vector<16x1xf32>
    %cst_16 = arith.constant 2.000000e+00 : f32
    %23 = vector.broadcast %cst_16 : f32 to vector<16x1xf32>
    %24 = arith.cmpf oeq, %2, %23 : vector<16x1xf32>
    %cst_17 = arith.constant 0.000000e+00 : f32
    %25 = vector.broadcast %cst_17 : f32 to vector<1x128xf32>
    %26 = vector.shape_cast %24 : vector<16x1xi1> to vector<16x1xi1>
    %27 = vector.broadcast %26 : vector<16x1xi1> to vector<16x128xi1>
    %28 = vector.shape_cast %18 : vector<1x128xf32> to vector<1x128xf32>
    %29 = vector.broadcast %28 : vector<1x128xf32> to vector<16x128xf32>
    %30 = vector.shape_cast %25 : vector<1x128xf32> to vector<1x128xf32>
    %31 = vector.broadcast %30 : vector<1x128xf32> to vector<16x128xf32>
    %32 = arith.select %27, %29, %31 : vector<16x128xi1>, vector<16x128xf32>
    %33 = vector.shape_cast %22 : vector<16x1xi1> to vector<16x1xi1>
    %34 = vector.broadcast %33 : vector<16x1xi1> to vector<16x128xi1>
    %35 = vector.shape_cast %17 : vector<1x128xf32> to vector<1x128xf32>
    %36 = vector.broadcast %35 : vector<1x128xf32> to vector<16x128xf32>
    %37 = arith.select %34, %36, %32 : vector<16x128xi1>, vector<16x128xf32>
    %38 = vector.shape_cast %20 : vector<16x1xi1> to vector<16x1xi1>
    %39 = vector.broadcast %38 : vector<16x1xi1> to vector<16x128xi1>
    %40 = vector.shape_cast %16 : vector<1x128xf32> to vector<1x128xf32>
    %41 = vector.broadcast %40 : vector<1x128xf32> to vector<16x128xf32>
    %42 = arith.select %39, %41, %37 : vector<16x128xi1>, vector<16x128xf32>
    %43 = arith.addf %15, %42 : vector<16x128xf32>
    %c0_18 = arith.constant 0 : index
    %c0_19 = arith.constant 0 : index
    %44 = vector.load %arg5[%c0_18, %c0_19] : memref<16x256xf32, #tpu.memory_space<vmem>>, vector<16x128xf32>
    tpu.vector_store %arg5[%c0_18, %c0_19], %43 {strides = array<i32>} : memref<16x256xf32, #tpu.memory_space<vmem>>, vector<16x128xf32>,
    %45 = math.cos %14 : vector<16x128xf32>
    %c0_20 = arith.constant 0 : index
    %c128 = arith.constant 128 : index
    %46 = vector.load %arg4[%c0_20, %c128] : memref<3x256xf32, #tpu.memory_space<vmem>>, vector<1x128xf32>
    %c1_21 = arith.constant 1 : index
    %c128_22 = arith.constant 128 : index
    %47 = vector.load %arg4[%c1_21, %c128_22] : memref<3x256xf32, #tpu.memory_space<vmem>>, vector<1x128xf32>
    %c2_23 = arith.constant 2 : index
    %c128_24 = arith.constant 128 : index
    %48 = vector.load %arg4[%c2_23, %c128_24] : memref<3x256xf32, #tpu.memory_space<vmem>>, vector<1x128xf32>
    %cst_25 = arith.constant 0.000000e+00 : f32
    %49 = vector.broadcast %cst_25 : f32 to vector<16x1xf32>
    %50 = arith.cmpf oeq, %2, %49 : vector<16x1xf32>
    %cst_26 = arith.constant 1.000000e+00 : f32
    %51 = vector.broadcast %cst_26 : f32 to vector<16x1xf32>
    %52 = arith.cmpf oeq, %2, %51 : vector<16x1xf32>
    %cst_27 = arith.constant 2.000000e+00 : f32
    %53 = vector.broadcast %cst_27 : f32 to vector<16x1xf32>
    %54 = arith.cmpf oeq, %2, %53 : vector<16x1xf32>
    %cst_28 = arith.constant 0.000000e+00 : f32
    %55 = vector.broadcast %cst_28 : f32 to vector<1x128xf32>
    %56 = vector.shape_cast %54 : vector<16x1xi1> to vector<16x1xi1>
    %57 = vector.broadcast %56 : vector<16x1xi1> to vector<16x128xi1>
    %58 = vector.shape_cast %48 : vector<1x128xf32> to vector<1x128xf32>
    %59 = vector.broadcast %58 : vector<1x128xf32> to vector<16x128xf32>
    %60 = vector.shape_cast %55 : vector<1x128xf32> to vector<1x128xf32>
    %61 = vector.broadcast %60 : vector<1x128xf32> to vector<16x128xf32>
    %62 = arith.select %57, %59, %61 : vector<16x128xi1>, vector<16x128xf32>
    %63 = vector.shape_cast %52 : vector<16x1xi1> to vector<16x1xi1>
    %64 = vector.broadcast %63 : vector<16x1xi1> to vector<16x128xi1>
    %65 = vector.shape_cast %47 : vector<1x128xf32> to vector<1x128xf32>
    %66 = vector.broadcast %65 : vector<1x128xf32> to vector<16x128xf32>
    %67 = arith.select %64, %66, %62 : vector<16x128xi1>, vector<16x128xf32>
    %68 = vector.shape_cast %50 : vector<16x1xi1> to vector<16x1xi1>
    %69 = vector.broadcast %68 : vector<16x1xi1> to vector<16x128xi1>
    %70 = vector.shape_cast %46 : vector<1x128xf32> to vector<1x128xf32>
    %71 = vector.broadcast %70 : vector<1x128xf32> to vector<16x128xf32>
    %72 = arith.select %69, %71, %67 : vector<16x128xi1>, vector<16x128xf32>
    %73 = arith.addf %45, %72 : vector<16x128xf32>
    %c0_29 = arith.constant 0 : index
    %c128_30 = arith.constant 128 : index
    %74 = vector.load %arg5[%c0_29, %c128_30] : memref<16x256xf32, #tpu.memory_space<vmem>>, vector<16x128xf32>
    tpu.vector_store %arg5[%c0_29, %c128_30], %73 {strides = array<i32>} : memref<16x256xf32, #tpu.memory_space<vmem>>, vector<16x128xf32>,
    return
  }
  func.func @transform_0(%arg0: i32) -> (i32, i32) {
    %c0_i32 = arith.constant 0 : i32
    %c0_i32_0 = arith.constant 0 : i32
    return %arg0, %c0_i32 : i32, i32
  }
  func.func @transform_1(%arg0: i32) -> (i32, i32) {
    %c0_i32 = arith.constant 0 : i32
    %c0_i32_0 = arith.constant 0 : i32
    %c0_i32_1 = arith.constant 0 : i32
    return %c0_i32, %c0_i32_0 : i32, i32
  }
  func.func @transform_2(%arg0: i32) -> (i32, i32) {
    %c0_i32 = arith.constant 0 : i32
    %c0_i32_0 = arith.constant 0 : i32
    %c0_i32_1 = arith.constant 0 : i32
    return %c0_i32, %c0_i32_0 : i32, i32
  }
  func.func @transform_3(%arg0: i32) -> (i32, i32) {
    %c0_i32 = arith.constant 0 : i32
    %c0_i32_0 = arith.constant 0 : i32
    %c0_i32_1 = arith.constant 0 : i32
    return %c0_i32, %c0_i32_0 : i32, i32
  }
  func.func @transform_4(%arg0: i32) -> (i32, i32) {
    %c0_i32 = arith.constant 0 : i32
    %c0_i32_0 = arith.constant 0 : i32
    return %arg0, %c0_i32 : i32, i32
  }
}

</mosaic_0001>

<bundles_post_ra>
// kernel: tpu_custom_call.1
= control target key start
LH: loop header
LB: loop body
LE: loop exit
PB: predicated region body
PF: predicated region fallthrough
CT: control target
= control target key end

     0   :  { %9 = vsyncpa [#allocation3], 0  ;;  %s1591_s0 = inlined_call_operand.vmem [shape: f32[32,3], index: 0, kind: input, shape index: {}]   ;;  %s1592_s1 = inlined_call_operand.vmem [shape: f32[2,128], index: 1, kind: input, shape index: {}]   ;;  %s1593_s2 = inlined_call_operand.vmem [shape: f32[1,128], index: 2, kind: input, shape index: {}]   ;;  %s1594_s3 = inlined_call_operand.vmem [shape: f32[3,256], index: 3, kind: input, shape index: {}]   ;;  %s1595_s4 = inlined_call_operand.hbm [shape: f32[18,256], index: 4, kind: output, shape index: {}]  }
   0x1   :  { %11 = vsyncpa [#allocation3 + $0x1], 0  ;;  %s1221_s15 = smov 0   ;;  %s1223_s16 = smov 0  }
   0x2   :  { %s1225_s17 = smov 0   ;;  %s1227_s18 = smov 0  }
   0x3 LB: > { %s1242_s19 = sadd.s32 4294967295, %s1182_s18   ;;  %s1013_s20 = sadd.s32 4294967294, %s1182_s18   ;;  %s1182_s18 = sphi %s1227_s18, %s1604_s18   ;;  %s1178_s17 = sphi %s1225_s17, %s1603_s17   ;;  %s1174_s16 = sphi %s1223_s16, %s1602_s16   ;;  %s1170_s15 = sphi %s1221_s15, %s1601_s15  }
   0x4   : > { %s1246_s21 = sadd.s32 1, %s1182_s18   ;;  %s113_s22 = sadd.s32 1, %s1178_s17 }
   0x5   : > { %s110_s23 = ssub.s32 %s1182_s18, %s1246_s21  ;;  %p123_p0 = scmp.ne.s32.totalorder %s1178_s17, %s1174_s16 }
   0x6   : > { %p111_p1 = scmp.eq.s32.totalorder %s110_s23, 0  ;;  %p124_p2 = scmp.eq.s32.totalorder %s1242_s19, 1 }
   0x7   : > { %p129_p3 = scmp.ne.s32.totalorder %s1174_s16, %s1170_s15  ;;  %p130_p4 = scmp.eq.s32.totalorder %s1013_s20, 1 }
   0x8   : > { %s1257_s24 = scalar_select %p111_p1, %s1178_s17, %s113_s22  }
   0x9   : > { %p1259_p5 = por %p124_p2, %p123_p0  ;;  %p1263_p6 = por %p130_p4, %p129_p3 }
   0xa   : > { %p1016_p7 = scmp.ge.s32.totalorder %s1182_s18, 1  ;;  %p166_p8 = scmp.lt.s32.totalorder %s1182_s18, 3 }
   0xc   : > { %p167_p9 = pnand %p1016_p7, %p166_p8 }
   0xd   : > { %s1270_s27 = sshll.u32 (!%p167_p9), %s1242_s19, 1  ;;  %s189_s7 = sand.u32 (!%p167_p9), 1, %s1174_s16  }
   0xe   : > { %170 = sbr.rel (%p167_p9) target bundleno = 296 (0x128), region = 36  ;;  %p193_p10 = scmp.lt.s32.totalorder (!%p167_p9), %s1270_s27, 3 }
   0xf   : > { %s1017_s11 = sshll.u32 (!%p167_p9), %s189_s7, 5  ;;  %s1530_s13 = scalar_lea.sflag (!%p167_p9), [#allocation3], %s189_s7 }
  0x10   : > { %s1511_s12 = scalar_lea.vmem (!%p167_p9), [#allocation2], %s1017_s11 }
  0x13   : > { %v1184_v0 = vmov 1   ;;  %v1185_v1 = vmov 0   ;;  %v1186_v2 = vmov 2   ;;  %s194_s28 = scalar_select %p193_p10, %s1270_s27, 3  ;;  %v1100_v11 = vld [vmem:[%s1592_s1 + $0x1] ss:$0 sm:$0xff] }
  0x14   : > { %1096 = vset.pattern.permute.xlu1 %v1184_v0  ;;  %1095 = vset.pattern.permute.xlu0 %v1185_v1  ;;  %v1101_v12 = vld [vmem:[%s1592_s1] ss:$0 sm:$0xff]  ;;  %v1187_v44 = vmov 2102212464   ;;  %v1188_v46 = vmov 920167782  }
  0x15   : > { %1097 = vset.pattern.permute.xlu2 %v1186_v2  ;;  %s1019_s29 = sshll.u32 %s194_s28, 3  ;;  %v1102_v16 = vld [vmem:[%s1593_s2] ss:$0 sm:$0xff]  ;;  %v1189_v49 = vmov 1326507024   ;;  %s935_s14 = ssub.s32 (%p1259_p5), 3, %s1270_s27 }
  0x16   : > { %s196_s6 = scalar_lea.vmem %s1591_s0, %s1019_s29  ;;  %v1190_v52 = vmov 683565275   ;;  %v1191_v54 = vmov 2475754826   ;;  %v1192_v59 = vmov 2131351028  }
  0x17   : > { %v204_v3 = vld [vmem:[%s196_s6] sm:$0xff]  ;;  %v205_v5 = vld [vmem:[%s196_s6 + $0x8] sm:$0xff]  ;;  %p936_p11 = scmp.lt.s32.totalorder (%p1259_p5), %s935_s14, 2 }
  0x18   : > { %222 = vperm.xlu1 %1096, %v204_v3   ;;  %209 = vperm.xlu0 %1095, %v204_v3   ;;  %vm557_vm0 = vcmp.eq.f32.partialorder %v204_v3, 2.0  ;;  %vm558_vm1 = vcmp.eq.f32.partialorder %v205_v5, 2.0  ;;  %vm556_vm2 = vcmp.eq.f32.partialorder %v205_v5, 1.0  ;;  %vm555_vm3 = vcmp.eq.f32.partialorder %v204_v3, 1.0 }
  0x19   : > { %v559_v4 = vsel %vm557_vm0, 1, %v1185_v1  ;;  %v560_v6 = vsel %vm558_vm1, 1, %v1185_v1  ;;  %v573_v7 = vsel %vm556_vm2, 1, %v1185_v1  ;;  %v572_v8 = vsel %vm555_vm3, 1, %v1185_v1 }
  0x1a   : > { %562 = vperm.xlu2 %1097, %v559_v4   ;;  %vm554_vm4 = vcmp.eq.f32.partialorder %v205_v5, 0.0  ;;  %vm553_vm5 = vcmp.eq.f32.partialorder %v204_v3, 0.0 }
  0x1b   : > { %v586_v9 = vsel %vm554_vm4, 1, %v1185_v1  ;;  %v585_v10 = vsel %vm553_vm5, 1, %v1185_v1 }
  0x20   : > { %226 = vperm.xlu1 %1096, %v205_v5   ;;  %214 = vperm.xlu0 %1095, %v205_v5  }
  0x22   : > { %565 = vperm.xlu2 %1097, %v560_v6  }
  0x28   : > { %1099 = vset.pattern.permute.xlu1 %v1186_v2  ;;  %1098 = vset.pattern.permute.xlu0 %v1186_v2 }
  0x29   : > { %578 = vperm.xlu1 %1099, %v573_v7   ;;  %575 = vperm.xlu0 %1098, %v572_v8  }
  0x2a   : > { %588 = vperm.xlu2 %1097, %v585_v10  }
  0x31   : > { %591 = vperm.xlu1 %1099, %v586_v9  }
  0x8a   : > { %v223_v13 = vpop.permute.xlu1 %222  ;;  %v210_v14 = vpop.permute.xlu0 %209 }
  0x8b   : > { %v230_v15 = vmul.f32 %v1100_v11, %v223_v13  ;;  %v218_v17 = vmul.f32 %v1101_v12, %v210_v14 }
  0x8d   : > { %v232_v18 = vadd.f32 %v230_v15, %v218_v17 }
  0x8f   : > { %v1294_v19 = vadd.f32 %v1102_v16, %v232_v18 }
  0x91   : > { %v243_v20 = vand.u32 2139095040, %v1294_v19  ;;  %v240_v21 = vand.u32 2147483647, %v1294_v19 }
  0x92   : > { %v227_v22 = vpop.permute.xlu1 %226  ;;  %v215_v23 = vpop.permute.xlu0 %214 }
  0x93   : > { %v244_v24 = vshrl.u32 %v243_v20, 23  ;;  %v231_v25 = vmul.f32 %v1100_v11, %v227_v22  ;;  %v219_v26 = vmul.f32 %v1101_v12, %v215_v23  ;;  %v247_v27 = vand.u32 8388607, %v240_v21 }
  0x95   : > { %v1020_v28 = vadd.s32 4294967169, %v244_v24  ;;  %v233_v29 = vadd.f32 %v231_v25, %v219_v26  ;;  %v248_v30 = vor.u32 8388608, %v247_v27 }
  0x97   : > { %v250_v31 = vadd.s32 1, %v1020_v28  ;;  %v1300_v32 = vadd.f32 %v1102_v16, %v233_v29  ;;  %v1303_v35 = vshll.u32 %v248_v30, 8 }
  0x99   : > { %vm251_vm6 = vcmp.gt.s32.totalorder %v250_v31, 0  ;;  %v398_v33 = vand.u32 2139095040, %v1300_v32  ;;  %v1308_v41 = vand.u32 65535, %v1303_v35  ;;  %v1311_v42 = vshrl.u32 %v1303_v35, 16 }
  0x9a   : > { %v252_v34 = vsel %vm251_vm6, %v250_v31, 0  ;;  %v395_v43 = vand.u32 2147483647, %v1300_v32 }
  0x9b   : > { %v254_v36 = vand.u32 31, %v252_v34  ;;  %v399_v37 = vshrl.u32 %v398_v33, 23  ;;  %v1305_v38 = vshrl.u32 %v252_v34, 5 }
  0x9c   : > { %v1335_v10 = vand.u32 8388607, %v395_v43 }
  0x9d   : > { %v255_v39 = vsub.s32 32, %v254_v36  ;;  %v1023_v40 = vadd.s32 4294967169, %v399_v37  ;;  %v266_v45 = vshll.u32 %v1187_v44, %v254_v36  ;;  %v269_v48 = vshll.u32 %v1188_v46, %v254_v36 }
  0x9e   : > { %vm275_vm7 = vcmp.lt.s32.totalorder %v1305_v38, 4  ;;  %v257_v53 = vshll.u32 %v1190_v52, %v254_v36  ;;  %v260_v58 = vshll.u32 %v1191_v54, %v254_v36  ;;  %v263_v62 = vshll.u32 %v1192_v59, %v254_v36 }
  0x9f   : > { %v267_v47 = vshrl.u32 %v1188_v46, %v255_v39  ;;  %v270_v50 = vshrl.u32 %v1189_v49, %v255_v39  ;;  %v405_v51 = vadd.s32 1, %v1023_v40  ;;  %v258_v55 = vshrl.u32 %v1191_v54, %v255_v39 }
  0xa0   : > { %v261_v60 = vshrl.u32 %v1192_v59, %v255_v39  ;;  %v264_v63 = vshrl.u32 %v1187_v44, %v255_v39  ;;  %v256_v2 = vshrl.u32 %v1190_v52, %v255_v39  ;;  %vm272_vm9 = vcmp.lt.s32.totalorder %v1305_v38, 1 }
  0xa1   : > { %v268_v56 = vor.u32 %v267_v47, %v266_v45  ;;  %v271_v57 = vor.u32 %v270_v50, %v269_v48  ;;  %vm406_vm8 = vcmp.gt.s32.totalorder %v405_v51, 0  ;;  %v259_v61 = vor.u32 %v258_v55, %v257_v53 }
  0xa2   : > { %v407_v0 = vsel %vm406_vm8, %v405_v51, 0  ;;  %v262_v3 = vor.u32 %v261_v60, %v260_v58  ;;  %v265_v7 = vor.u32 %v264_v63, %v263_v62  ;;  %vm273_vm10 = vcmp.lt.s32.totalorder %v1305_v38, 2 }
  0xa3   : > { %v281_v4 = vsel %vm275_vm7, %v268_v56, 920167782  ;;  %v285_v5 = vsel %vm275_vm7, %v271_v57, 1326507024  ;;  %v1328_v6 = vand.u32 31, %v407_v0  ;;  %v1330_v8 = vshrl.u32 %v407_v0, 5 }
  0xa4   : > { %v280_v9 = vsel %vm272_vm9, %v259_v61, %v262_v3  ;;  %vm274_vm11 = vcmp.lt.s32.totalorder %v1305_v38, 3  ;;  %v276_v13 = vsel %vm272_vm9, %v256_v2, %v259_v61  ;;  %v277_v14 = vsel %vm275_vm7, %v265_v7, 2102212464 }
  0xa5   : > { %v1338_v11 = vsub.s32 32, %v1328_v6  ;;  %v421_v12 = vshll.u32 %v1187_v44, %v1328_v6  ;;  %v282_v15 = vsel %vm274_vm11, %v265_v7, %v281_v4  ;;  %v284_v16 = vsel %vm272_vm9, %v262_v3, %v265_v7 }
  0xa6   : > { %v286_v17 = vsel %vm274_vm11, %v268_v56, %v285_v5  ;;  %v424_v20 = vshll.u32 %v1188_v46, %v1328_v6  ;;  %v283_v23 = vsel %vm273_vm10, %v280_v9, %v282_v15  ;;  %v278_v24 = vsel %vm274_vm11, %v262_v3, %v277_v14 }
  0xa7   : > { %v422_v18 = vshrl.u32 %v1188_v46, %v1338_v11  ;;  %v425_v22 = vshrl.u32 %v1189_v49, %v1338_v11  ;;  %v287_v25 = vsel %vm273_vm10, %v284_v16, %v286_v17  ;;  %v313_v26 = vand.u32 65535, %v283_v23 }
  0xa8   : > { %v314_v27 = vshrl.u32 %v283_v23, 16  ;;  %v291_v30 = vand.u32 65535, %v287_v25  ;;  %v292_v31 = vshrl.u32 %v287_v25, 16  ;;  %vm430_vm12 = vcmp.lt.s32.totalorder %v1330_v8, 4 }
  0xa9   : > { %v423_v28 = vor.u32 %v422_v18, %v421_v12  ;;  %v426_v29 = vor.u32 %v425_v22, %v424_v20  ;;  %v317_v34 = vmul.u32 %v313_v26, %v1311_v42  ;;  %v279_v36 = vsel %vm273_vm10, %v276_v13, %v278_v24 }
  0xaa   : > { %v316_v33 = vmul.u32 %v314_v27, %v1308_v41  ;;  %v294_v37 = vmul.u32 %v292_v31, %v1308_v41  ;;  %v403_v39 = vor.u32 8388608, %v1335_v10  ;;  %v295_v40 = vmul.u32 %v291_v30, %v1311_v42 }
  0xab   : > { %v315_v45 = vmul.u32 %v313_v26, %v1308_v41  ;;  %v318_v46 = vmul.u32 %v314_v27, %v1311_v42  ;;  %v436_v48 = vsel %vm430_vm12, %v423_v28, 920167782  ;;  %v440_v49 = vsel %vm430_vm12, %v426_v29, 1326507024 }
  0xac   : > { %v319_v47 = vshll.u32 %v316_v33, 16  ;;  %v293_v38 = vmul.u32 %v291_v30, %v1308_v41  ;;  %v297_v50 = vshll.u32 %v294_v37, 16  ;;  %v296_v51 = vmul.u32 %v292_v31, %v1311_v42 }
  0xad   : > { %v321_v53 = vshll.u32 %v317_v34, 16  ;;  %v299_v56 = vshll.u32 %v295_v40, 16  ;;  %v320_v61 = vshrl.u32 %v316_v33, 16  ;;  %v298_v63 = vshrl.u32 %v294_v37, 16 }
  0xae   : > { %vm323_vm13 = vc.u32 %v315_v45, %v319_v47  ;;  %v325_v55 = vadd.s32 %v319_v47, %v315_v45  ;;  %vm301_vm14 = vc.u32 %v293_v38, %v297_v50  ;;  %v303_v57 = vadd.s32 %v297_v50, %v293_v38 }
  0xaf   : > { %v324_v58 = vsel %vm323_vm13, 1, %v1185_v1  ;;  %v302_v60 = vsel %vm301_vm14, 1, %v1185_v1  ;;  %v412_v3 = vshll.u32 %v1190_v52, %v1328_v6  ;;  %v413_v4 = vshrl.u32 %v1191_v54, %v1338_v11 }
  0xb0   : > { %v326_v62 = vadd.s32 %v324_v58, %v318_v46  ;;  %vm327_vm15 = vc.u32 %v325_v55, %v321_v53  ;;  %v304_v0 = vadd.s32 %v302_v60, %v296_v51  ;;  %vm305_vm0 = vc.u32 %v303_v57, %v299_v56 }
  0xb1   : > { %v328_v41 = vsel %vm327_vm15, 1, %v1185_v1  ;;  %v306_v42 = vsel %vm305_vm0, 1, %v1185_v1  ;;  %v322_v7 = vshrl.u32 %v317_v34, 16  ;;  %v415_v9 = vshll.u32 %v1191_v54, %v1328_v6 }
  0xb2   : > { %v330_v2 = vadd.s32 %v328_v41, %v326_v62  ;;  %v308_v5 = vadd.s32 %v306_v42, %v304_v0  ;;  %v416_v10 = vshrl.u32 %v1192_v59, %v1338_v11  ;;  %v1380_v13 = vor.u32 %v413_v4, %v412_v3 }
  0xb3   : > { %v418_v14 = vshll.u32 %v1192_v59, %v1328_v6  ;;  %v419_v15 = vshrl.u32 %v1187_v44, %v1338_v11  ;;  %v300_v16 = vshrl.u32 %v295_v40, 16  ;;  %v1386_v18 = vadd.s32 %v325_v55, %v321_v53 }
  0xb4   : > { %v331_v12 = vadd.s32 %v330_v2, %v320_v61  ;;  %v309_v17 = vadd.s32 %v308_v5, %v298_v63  ;;  %v1388_v20 = vor.u32 %v416_v10, %v415_v9  ;;  %vm427_vm1 = vcmp.lt.s32.totalorder %v1330_v8, 1 }
  0xb5   : > { %v420_v54 = vor.u32 %v419_v15, %v418_v14  ;;  %vm429_vm2 = vcmp.lt.s32.totalorder %v1330_v8, 3  ;;  %v1400_v6 = vshll.u32 %v403_v39, 8  ;;  %vm428_vm3 = vcmp.lt.s32.totalorder %v1330_v8, 2 }
  0xb6   : > { %v332_v22 = vadd.s32 %v331_v12, %v322_v7  ;;  %v1392_v23 = vadd.s32 %v309_v17, %v300_v16  ;;  %v435_v59 = vsel %vm427_vm1, %v1380_v13, %v1388_v20  ;;  %v441_v44 = vsel %vm429_vm2, %v423_v28, %v440_v49 }
  0xb7   : > { %v437_v25 = vsel %vm429_vm2, %v420_v54, %v436_v48  ;;  %v439_v26 = vsel %vm427_vm1, %v1388_v20, %v420_v54  ;;  %v333_v27 = vmul.u32 %v1303_v35, %v279_v36  ;;  %v444_v31 = vand.u32 65535, %v1400_v6 }
  0xb8   : > { %v336_v24 = vadd.s32 1, %v332_v22  ;;  %vm335_vm4 = vc.u32 %v1392_v23, %v1386_v18  ;;  %v438_v28 = vsel %vm428_vm3, %v435_v59, %v437_v25  ;;  %v442_v30 = vsel %vm428_vm3, %v439_v26, %v441_v44 }
  0xb9   : > { %v445_v34 = vshrl.u32 %v1400_v6, 16  ;;  %v446_v37 = vand.u32 65535, %v442_v30  ;;  %v447_v39 = vshrl.u32 %v442_v30, 16  ;;  %v468_v40 = vand.u32 65535, %v438_v28 }
  0xba   : > { %v337_v29 = vsel %vm335_vm4, %v336_v24, %v332_v22  ;;  %v469_v45 = vshrl.u32 %v438_v28, 16  ;;  %v411_v10 = vshrl.u32 %v1190_v52, %v1338_v11  ;;  %v432_v12 = vsel %vm430_vm12, %v420_v54, 2102212464 }
  0xbb   : > { %v338_v33 = vadd.s32 %v337_v29, %v333_v27  ;;  %v449_v36 = vmul.u32 %v447_v39, %v444_v31  ;;  %v450_v46 = vmul.u32 %v446_v37, %v445_v34  ;;  %v448_v49 = vmul.u32 %v446_v37, %v444_v31 }
  0xbc   : > { %v471_v47 = vmul.u32 %v469_v45, %v444_v31  ;;  %v451_v50 = vmul.u32 %v447_v39, %v445_v34  ;;  %v470_v51 = vmul.u32 %v468_v40, %v444_v31  ;;  %v472_v53 = vmul.u32 %v468_v40, %v445_v34 }
  0xbd   : > { %v339_v35 = vadd.s32 536870912, %v338_v33  ;;  %v452_v38 = vshll.u32 %v449_v36, 16  ;;  %v454_v57 = vshll.u32 %v450_v46, 16  ;;  %v473_v63 = vmul.u32 %v469_v45, %v445_v34 }
  0xbe   : > { %v474_v55 = vshll.u32 %v471_v47, 16  ;;  %v476_v41 = vshll.u32 %v472_v53, 16  ;;  %v453_v4 = vshrl.u32 %v449_v36, 16  ;;  %v455_v15 = vshrl.u32 %v450_v46, 16 }
  0xbf   : > { %v1417_v48 = vshrl.u32 %v339_v35, 30  ;;  %vm456_vm5 = vc.u32 %v448_v49, %v452_v38  ;;  %v458_v58 = vadd.s32 %v452_v38, %v448_v49  ;;  %v475_v22 = vshrl.u32 %v471_v47, 16 }
  0xc0   : > { %v457_v60 = vsel %vm456_vm5, 1, %v1185_v1  ;;  %vm478_vm6 = vc.u32 %v470_v51, %v474_v55  ;;  %v480_v2 = vadd.s32 %v474_v55, %v470_v51  ;;  %v431_v24 = vsel %vm427_vm1, %v411_v10, %v1380_v13 }
  0xc1   : > { %v341_v56 = vshll.u32 %v1417_v48, 30  ;;  %v459_v62 = vadd.s32 %v457_v60, %v451_v50  ;;  %vm460_vm7 = vc.u32 %v458_v58, %v454_v57  ;;  %v479_v42 = vsel %vm478_vm6, 1, %v1185_v1 }
  0xc2   : > { %v461_v0 = vsel %vm460_vm7, 1, %v1185_v1  ;;  %v481_v7 = vadd.s32 %v479_v42, %v473_v63  ;;  %vm482_vm9 = vc.u32 %v480_v2, %v476_v41  ;;  %v433_v25 = vsel %vm429_vm2, %v1388_v20, %v432_v12 }
  0xc3   : > { %v342_v61 = vsub.s32 %v338_v33, %v341_v56  ;;  %v463_v5 = vadd.s32 %v461_v0, %v459_v62  ;;  %v483_v17 = vsel %vm482_vm9, 1, %v1185_v1  ;;  %v477_v11 = vshrl.u32 %v472_v53, 16 }
  0xc4   : > { %v485_v59 = vadd.s32 %v483_v17, %v481_v7  ;;  %v484_v54 = vadd.s32 %v480_v2, %v476_v41  ;;  %v434_v1 = vsel %vm428_vm3, %v431_v24, %v433_v25  ;;  %v334_v29 = vadd.s32 %v1386_v18, %v1392_v23  ;;  %v563_v18 = vpop.permute.xlu2 %562  ;;  %v1466_v17 = vld [vmem:[%s1594_s3 + $0x6] ss:$0 sm:$0xff]  ;;  %v576_v24 = vpop.permute.xlu0 %575 }
  0xc5   : > { %vm343_vm8 = vcmp.lt.s32.totalorder %v342_v61, 0  ;;  %v344_v3 = vsub.s32 0, %v342_v61  ;;  %v464_v16 = vadd.s32 %v463_v5, %v453_v4  ;;  %v488_v37 = vmul.u32 %v1400_v6, %v434_v1  ;;  %v1476_v1 = vld [vmem:[%s1594_s3 + $0x5] ss:$0 sm:$0xff] }
  0xc6   : > { %v486_v26 = vadd.s32 %v485_v59, %v475_v22  ;;  %vm1444_vm12 = vcmp.le.f32.partialorder %v240_v21, 0.7853982  ;;  %vm242_vm13 = vcmp.lt.s32.totalorder %v1294_v19, 0  ;;  %v364_v55 = vsub.s32 4, %v1417_v48 }
  0xc7   : > { %v345_v9 = vsel %vm343_vm8, %v344_v3, %v342_v61  ;;  %v465_v52 = vadd.s32 %v464_v16, %v455_v15  ;;  %v1461_v16 = vld [vmem:[%s1594_s3 + $0x2] ss:$0 sm:$0xff]  ;;  %vm567_vm0 = vcmp.eq.s32.totalorder %v563_v18, 1  ;;  %vm580_vm1 = vcmp.eq.s32.totalorder %v576_v24, 1 }
  0xc8   : > { %v346_v14 = vclz %v345_v9  ;;  %v487_v28 = vadd.s32 %v486_v26, %v477_v11  ;;  %v365_v62 = vsel %vm242_vm13, %v364_v55, %v1417_v48  ;;  %v1471_v26 = vld [vmem:[%s1594_s3 + $0x1] ss:$0 sm:$0xff]  ;;  %vm383_vm2 = vweird.f32 %v1294_v19 }
  0xc9   : > { %vm490_vm11 = vc.u32 %v465_v52, %v484_v54  ;;  %v367_v3 = vsel %vm1444_vm12, 0, %v365_v62  ;;  %v489_v9 = vadd.s32 %v484_v54, %v465_v52 }
  0xca   : > { %v1021_v44 = vadd.s32 4294967294, %v346_v14  ;;  %v491_v13 = vadd.s32 1, %v487_v28  ;;  %v384_v48 = vadd.s32 3, %v367_v3  ;;  %v746_v11 = vand.u32 3, %v367_v3 }
  0xcc   : > { %vm1022_vm10 = vcmp.lt.s32.totalorder %v1021_v44, 0  ;;  %v492_v39 = vsel %vm490_vm11, %v491_v13, %v487_v28  ;;  %v1454_v41 = vpop.permute.xlu2 %565  ;;  %v914_v13 = vsel %vm567_vm0, %v1466_v17, 0.0  ;;  %vm747_vm3 = vcmp.lt.s32.totalorder %v746_v11, 2 }
  0xcd   : > { %v349_v27 = vsel %vm1022_vm10, 0, %v1021_v44  ;;  %v493_v35 = vadd.s32 %v492_v39, %v488_v37  ;;  %vm748_vm4 = vcmp.eq.s32.totalorder %v746_v11, 0  ;;  %vm751_vm5 = vcmp.eq.s32.totalorder %v746_v11, 2 }
  0xce   : > { %v350_v30 = vsub.s32 32, %v349_v27  ;;  %v354_v31 = vsub.s32 4294967266, %v349_v27  ;;  %v351_v33 = vshll.u32 %v342_v61, %v349_v27  ;;  %vm397_vm10 = vcmp.lt.s32.totalorder %v1300_v32, 0 }
  0xcf   : > { %v494_v8 = vadd.s32 536870912, %v493_v35  ;;  %vm396_vm11 = vcmp.le.f32.partialorder %v395_v43, 0.7853982 }
  0xd0   : > { %v352_v34 = vshrl.u32 %v334_v29, %v350_v30  ;;  %v355_v20 = vadd.s32 127, %v354_v31  ;;  %v385_v30 = vand.u32 3, %v384_v48  ;;  %v570_v31 = vsel %vm567_vm0, %v1461_v16, 0.0 }
  0xd1   : > { %v1439_v49 = vshrl.u32 %v494_v8, 30  ;;  %v1486_v8 = vld [vmem:[%s1594_s3] ss:$0 sm:$0xff] }
  0xd2   : > { %v353_v40 = vor.u32 %v352_v34, %v351_v33  ;;  %v356_v45 = vshll.u32 %v355_v20, 23  ;;  %vm386_vm6 = vcmp.lt.s32.totalorder %v385_v30, 2  ;;  %vm387_vm7 = vcmp.eq.s32.totalorder %v385_v30, 0 }
  0xd3   : > { %v496_v38 = vshll.u32 %v1439_v49, 30  ;;  %vm390_vm8 = vcmp.eq.s32.totalorder %v385_v30, 2 }
  0xd4   : > { %v357_v36 = vor.u32 4788187, %v356_v45  ;;  %v360_v47 = vcvt.s32.f32 %v353_v40  ;;  %v589_v37 = vpop.permute.xlu2 %588  ;;  %v583_v45 = vsel %vm580_vm1, %v1471_v26, %v570_v31 }
  0xd5   : > { %v497_v51 = vsub.s32 %v493_v35, %v496_v38  ;;  %v917_v35 = vsel %vm580_vm1, %v1476_v1, %v914_v13  ;;  %vm593_vm9 = vcmp.eq.s32.totalorder %v589_v37, 1 }
  0xd6   : > { %v358_v46 = vand.u32 2147483647, %v357_v36 }
  0xd7   : > { %vm498_vm14 = vcmp.lt.s32.totalorder %v497_v51, 0  ;;  %v499_v56 = vsub.s32 0, %v497_v51 }
  0xd8   : > { %v361_v23 = vmul.f32 %v360_v47, %v358_v46  ;;  %v1491_v46 = vld [vmem:[%s1594_s3 + $0x4] ss:$0 sm:$0xff] }
  0xd9   : > { %v500_v60 = vsel %vm498_vm14, %v499_v56, %v497_v51 }
  0xda   : > { %v362_v50 = vxor.u32 2147483648, %v361_v23  ;;  %v501_v61 = vclz %v500_v60 }
  0xdc   : > { %v363_v53 = vsel %vm242_vm13, %v362_v50, %v361_v23  ;;  %v1024_v0 = vadd.s32 4294967294, %v501_v61 }
  0xdd   : > { %v366_v57 = vsel %vm1444_vm12, %v1294_v19, %v363_v53  ;;  %vm568_vm12 = vcmp.eq.s32.totalorder %v1454_v41, 1 }
  0xde   : > { %v368_v58 = vmul.f32 %v366_v57, %v366_v57  ;;  %vm1025_vm15 = vcmp.lt.s32.totalorder %v1024_v0, 0 }
  0xdf   : > { %v504_v7 = vsel %vm1025_vm15, 0, %v1024_v0 }
  0xe0   : > { %v369_v21 = vmul.f32 -0.001358992, %v368_v58  ;;  %v376_v63 = vmul.f32 -0.00019511016, %v368_v58  ;;  %v505_v10 = vsub.s32 32, %v504_v7  ;;  %v509_v12 = vsub.s32 4294967266, %v504_v7 }
  0xe1   : > { %v506_v22 = vshll.u32 %v497_v51, %v504_v7 }
  0xe2   : > { %v370_v42 = vadd.f32 0.041655596, %v369_v21  ;;  %v377_v2 = vadd.f32 0.008332121, %v376_v63  ;;  %v507_v59 = vshrl.u32 %v489_v9, %v505_v10  ;;  %v510_v44 = vadd.s32 127, %v509_v12 }
  0xe3   : > { %v519_v21 = vsub.s32 4, %v1439_v49 }
  0xe4   : > { %v371_v4 = vmul.f32 %v370_v42, %v368_v58  ;;  %v378_v5 = vmul.f32 %v377_v2, %v368_v58  ;;  %v508_v54 = vor.u32 %v507_v59, %v506_v22  ;;  %v511_v27 = vshll.u32 %v510_v44, 23  ;;  %v579_v2 = vpop.permute.xlu1 %578 }
  0xe5   : > { %v520_v43 = vsel %vm397_vm10, %v519_v21, %v1439_v49  ;;  %v571_v22 = vsel %vm568_vm12, %v1461_v16, 0.0  ;;  %v915_v59 = vsel %vm568_vm12, %v1466_v17, 0.0  ;;  %vm581_vm13 = vcmp.eq.s32.totalorder %v579_v2, 1 }
  0xe6   : > { %v372_v14 = vadd.f32 -0.4999988, %v371_v4  ;;  %v379_v15 = vadd.f32 -0.16666654, %v378_v5  ;;  %v512_v33 = vor.u32 4788187, %v511_v27  ;;  %v515_v40 = vcvt.s32.f32 %v508_v54 }
  0xe7   : > { %v522_v5 = vsel %vm396_vm11, 0, %v520_v43  ;;  %v584_v27 = vsel %vm581_vm13, %v1471_v26, %v571_v22  ;;  %v918_v41 = vsel %vm581_vm13, %v1476_v1, %v915_v59 }
  0xe8   : > { %v373_v25 = vmul.f32 %v372_v14, %v368_v58  ;;  %v380_v52 = vmul.f32 %v379_v15, %v368_v58  ;;  %v513_v39 = vand.u32 2147483647, %v512_v33  ;;  %v920_v58 = vsel %vm593_vm9, %v1491_v46, %v917_v35 }
  0xe9   : > { %v539_v14 = vadd.s32 3, %v522_v5  ;;  %v900_v24 = vand.u32 3, %v522_v5 }
  0xea   : > { %v374_v28 = vadd.f32 1.0, %v373_v25  ;;  %v381_v29 = vadd.f32 1.0, %v380_v52  ;;  %v516_v47 = vmul.f32 %v515_v40, %v513_v39 }
  0xeb   : > { %v540_v25 = vand.u32 3, %v539_v14  ;;  %vm901_vm14 = vcmp.lt.s32.totalorder %v900_v24, 2  ;;  %vm902_vm15 = vcmp.eq.s32.totalorder %v900_v24, 0  ;;  %vm905_vm0 = vcmp.eq.s32.totalorder %v900_v24, 2 }
  0xec   : > { %v382_v34 = vmul.f32 %v381_v29, %v366_v57  ;;  %v391_v20 = vxor.u32 2147483648, %v374_v28  ;;  %v517_v53 = vxor.u32 2147483648, %v516_v47  ;;  %v596_v57 = vsel %vm593_vm9, %v1486_v8, %v583_v45  ;;  %v592_v52 = vpop.permute.xlu1 %591 }
  0xed   : > { %vm541_vm1 = vcmp.lt.s32.totalorder %v540_v25, 2 }
  0xee   : > { %v388_v36 = vxor.u32 2147483648, %v382_v34  ;;  %v392_v23 = vsel %vm390_vm8, %v391_v20, %v382_v34  ;;  %v753_v50 = vsel %vm751_vm5, %v391_v20, %v382_v34  ;;  %v518_v62 = vsel %vm397_vm10, %v517_v53, %v516_v47 }
  0xef   : > { %v521_v63 = vsel %vm396_vm11, %v1300_v32, %v518_v62  ;;  %vm538_vm5 = vweird.f32 %v1300_v32 }
  0xf0   : > { %v389_v18 = vsel %vm387_vm7, %v374_v28, %v388_v36  ;;  %v750_v38 = vsel %vm748_vm4, %v374_v28, %v388_v36  ;;  %v523_v19 = vmul.f32 %v521_v63, %v521_v63  ;;  %vm594_vm4 = vcmp.eq.s32.totalorder %v592_v52, 1 }
  0xf1   : > { %v393_v51 = vsel %vm386_vm6, %v389_v18, %v392_v23  ;;  %v754_v6 = vsel %vm747_vm3, %v750_v38, %v753_v50  ;;  %vm545_vm3 = vcmp.eq.s32.totalorder %v540_v25, 2  ;;  %v597_v13 = vsel %vm594_vm4, %v1486_v8, %v584_v27 }
  0xf2   : > { %v394_v55 = vsel %vm383_vm2, nan, %v393_v51  ;;  %v755_v56 = vsel %vm383_vm2, nan, %v754_v6  ;;  %v524_v0 = vmul.f32 -0.001358992, %v523_v19  ;;  %v531_v42 = vmul.f32 -0.00019511016, %v523_v19 }
  0xf3   : > { %v598_v60 = vadd.f32 %v596_v57, %v394_v55  ;;  %v922_v61 = vadd.f32 %v920_v58, %v755_v56  ;;  %vm542_vm2 = vcmp.eq.s32.totalorder %v540_v25, 0  ;;  %v921_v34 = vsel %vm594_vm4, %v1491_v46, %v918_v41 }
  0xf4   : > { %v525_v3 = vadd.f32 0.041655596, %v524_v0  ;;  %v532_v4 = vadd.f32 0.008332121, %v531_v42 }
  0xf5   : > { %600 = vst [vmem:[%s1511_s12] sm:$0xff] %v598_v60 }
  0xf6   : > { %924 = vst [vmem:[%s1511_s12 + $0x8] sm:$0xff] %v922_v61  ;;  %v526_v7 = vmul.f32 %v525_v3, %v523_v19  ;;  %v533_v9 = vmul.f32 %v532_v4, %v523_v19 }
  0xf8   : > { %v527_v10 = vadd.f32 -0.4999988, %v526_v7  ;;  %v534_v12 = vadd.f32 -0.16666654, %v533_v9 }
  0xfa   : > { %v528_v15 = vmul.f32 %v527_v10, %v523_v19  ;;  %v535_v48 = vmul.f32 %v534_v12, %v523_v19 }
  0xfc   : > { %v529_v44 = vadd.f32 1.0, %v528_v15  ;;  %v536_v49 = vadd.f32 1.0, %v535_v48 }
  0xfe   : > { %v537_v11 = vmul.f32 %v536_v49, %v521_v63  ;;  %v546_v54 = vxor.u32 2147483648, %v529_v44 }
 0x100   : > { %v543_v28 = vxor.u32 2147483648, %v537_v11  ;;  %v547_v17 = vsel %vm545_vm3, %v546_v54, %v537_v11  ;;  %v907_v30 = vsel %vm905_vm0, %v546_v54, %v537_v11 }
 0x102   : > { %v544_v16 = vsel %vm542_vm2, %v529_v44, %v543_v28  ;;  %v904_v29 = vsel %vm902_vm15, %v529_v44, %v543_v28 }
 0x103   : > { %v548_v26 = vsel %vm541_vm1, %v544_v16, %v547_v17  ;;  %v908_v31 = vsel %vm901_vm14, %v904_v29, %v907_v30 }
 0x104   : > { %v549_v1 = vsel %vm538_vm5, nan, %v548_v26  ;;  %v909_v33 = vsel %vm538_vm5, nan, %v908_v31  ;;  %933 = sbr.rel (!%p1259_p5) target bundleno = 296 (0x128), region = 40 }
 0x105   : > { %v599_v20 = vadd.f32 %v597_v13, %v549_v1  ;;  %v923_v37 = vadd.f32 %v921_v34, %v909_v33 }
 0x107   : > { %601 = vst [vmem:[%s1511_s12 + $0x10] sm:$0xff] %v599_v20 }
 0x108   : > { %925 = vst [vmem:[%s1511_s12 + $0x18] sm:$0xff] %v923_v37 }
 0x109   : > { %s1606_s14 = smov (!%p936_p11, %s935_s14), 2 }
 0x10a   : > { %s1043_s20 = sshll.u32 %s1606_s14, 4 }
 0x10b   : > { %s940_s22 = ssub.s32 32, %s1043_s20 }
 0x10c   : > { %s941_s23 = sshll.u32 %s940_s22, 4 }
 0x10d   : > { %942 = vsyncadd %s1530_s13, %s941_s23  ;;  %p1539_p12 = scmp.ne.s32.totalorder %s1043_s20, 0  ;;  %s1045_s25 = sshll.u32 %s1242_s19, 5 }
 0x10e   : > { %s946_s29 = scalar_lea.hbm %s1595_s4, %s1045_s25  ;;  %s948_s30 = sshll.u32 %s1511_s12, 4  ;;  %s1548_s30 = int_to_ptr.vmem [resolvable:$true] %s948_s30 }
 0x10f   : > { %s950_s5 = sshll.u32 %s946_s29, 4  ;;  %s1040_s6 = sshll.u32 %s1606_s14, 8  ;;  %s1550_s5 = int_to_ptr.hbm [resolvable:$true] %s950_s5 }
 0x110   : > { %s1109_s8 = sshra.s32 %s1548_s30, 4  ;;  %s1111_s9 = sshrl.u32 %s1040_s6, 4  ;;  %s1110_s8 = int_to_ptr.vmem [resolvable:$true] %s1109_s8 }
 0x111   : > { %s1116_s10 = scalar_lea.vmem %s1110_s8, %s1111_s9  ;;  %s1193_s19 = smov [#allocation2]  }
 0x112   : > { %p1117_p13 = scmp.ne.s32.totalorder %s1110_s8, %s1116_s10  ;;  %s1120_s11 = scalar_lea.vmem %s1193_s19, 64 }
 0x113   : > { %p1122_p2 = scmp.lt.s32.totalorder %s1120_s11, %s1116_s10 }
 0x114   : > { %p1118_p0 = pnand %p1117_p13, %p1539_p12 }
 0x116   : > { %p1119_p1 = pneg %p1118_p0 }
 0x118   : > { %p1124_p3 = pnand %p1122_p2, %p1119_p1 }
 0x11a   : > { %1127 = shalt.err (!%p1124_p3)
}
 0x11b   : > { %s1128_s12 = sshra.s32 %s1550_s5, 4  ;;  %s1139_s25 = scalar_lea.hbm %s1595_s4, 48  ;;  %s1129_s12 = int_to_ptr.hbm [resolvable:$true] %s1128_s12 }
 0x11c   : > { %s1135_s20 = scalar_lea.hbm %s1129_s12, %s1111_s9  ;;  %p1140_p8 = scmp.lt.s32.totalorder %s1129_s12, %s1595_s4 }
 0x11d   : > { %p1136_p4 = scmp.ne.s32.totalorder %s1129_s12, %s1135_s20  ;;  %p1141_p9 = scmp.lt.s32.totalorder %s1139_s25, %s1135_s20 }
 0x11f   : > { %p1137_p5 = pnand %p1136_p4, %p1539_p12  ;;  %p1142_p10 = por %p1141_p9, %p1140_p8 }
 0x121   : > { %p1138_p7 = pneg %p1137_p5 }
 0x123   : > { %p1143_p11 = pnand %p1142_p10, %p1138_p7 }
 0x125   : > { %1146 = shalt.err (!%p1143_p11)
}
 0x126   : > { %s1194_s29 = smov 256   ;;  %s1195_s8 = smov 16  }
 0x127   : > { %956 = dma.vmem_to_hbm [thread:$0]  (%p1539_p12), %s1548_s30, %s1040_s6, %s1550_s5, %s1530_s13, %s1194_s29, %s1194_s29, %s1195_s8  }
 0x128 PF: > { %p1051_p13 = scmp.ge.s32.totalorder %s1182_s18, 2  ;;  %s965_s9 = sand.u32 1, %s1170_s15  }
 0x129   : > { %s966_s10 = scalar_lea.sflag [#allocation3], %s965_s9 }
 0x12a   : > { %p1048_p0 = pnand %p1051_p13, %p1263_p6 }
 0x12c   : > { %p1049_p1 = pneg %p1048_p0 }
 0x12e   : > { %1165 = dma.done.wait (%p1049_p1), %s966_s10, 512  }
 0x12f   : > { %1167 = vsyncadd (%p1049_p1), %s966_s10, 4294966784  ;;  %p14_p2 = scmp.ge.s32.totalorder %s1246_s21, 4   ;;  %s1601_s15 = smov %s1174_s16 }
 0x130   : > { %s1602_s16 = smov %s1178_s17  ;;  %s1603_s17 = smov %s1257_s24 }
 0x131   : > { %s1604_s18 = smov %s1246_s21  ;;  %16 = sbr.rel (!%p14_p2) target bundleno = 3 (0x3), region = 71 }
 0x136   :  { %972 = vsyncpa [#allocation3], 1 }
 0x137   :  { %974 = vsyncpa [#allocation3 + $0x1], 1 }

</bundles_post_ra>
